<compile_context>
chip_gen: v5e
topology: v5e:2x2
jax: 0.10.0
libtpu: 0.0.40
codegen_flags: <defaults>
</compile_context>

<pallas_src>
import functools

import jax
import jax.numpy as jnp
from jax.experimental import pallas as pl
from jax.experimental.pallas import tpu as pltpu


def _odenet_hi_kernel(inp_ref, hid_ref, w1f_ref, w1h_ref, b1_ref, w2_ref, b2_ref, out_ref):
    x = inp_ref[...].astype(jnp.float32)                      # [bm, F]
    h = hid_ref[...].astype(jnp.float32)                      # [bm, H]

    # First Linear with the torch cat([x, h], 1) fused away:
    #   cat([x, h], 1) @ W1.T == x @ W1[:, :F].T + h @ W1[:, F:].T
    z = (jnp.dot(x, w1f_ref[...], preferred_element_type=jnp.float32)
         + jnp.dot(h, w1h_ref[...], preferred_element_type=jnp.float32)
         + b1_ref[...])
    z = jnp.tanh(z)                                           # [bm, Hmid_pad] lane-dense

    # Second Linear + Tanh, stored directly to the output tile.
    y = jnp.dot(z, w2_ref[...], preferred_element_type=jnp.float32) + b2_ref[...]
    out_ref[...] = jnp.tanh(y).astype(out_ref.dtype)          # [bm, H]


def _round_up(x, m):
    return -(-x // m) * m


def _pick_batch_tile(batch):
    """Batch tile: full extent for small batches; otherwise a multiple of 8, capped at
    128, chosen so batches >= 128 get at least 2 grid steps (v7x megacore)."""
    if batch <= 128:
        return batch                                   # single full-extent block (legal)
    return min(128, _round_up(-(-batch // 2), 8))


@functools.partial(jax.jit, static_argnames=())
def odenet_hi_forward(inp, t, dt, hidden, params):
    """JAX wrapper mirroring ODENetHI.forward(input, t, dt, hidden)."""
    del t, dt  # unused by the reference forward; kept for signature parity
    B, F = inp.shape
    _, H = hidden.shape

    w1 = params["w1"]                 # [Hmid, F + H]   (torch layout [out, in])
    b1 = params["b1"]                 # [Hmid]
    w2 = params["w2"]                 # [H, Hmid]
    b2 = params["b2"]                 # [H]

    # Pre-transpose + split W1 (no in-kernel concat) and zero-pad Hmid to a multiple of
    # 128 so the intermediate is lane-dense.  tanh(0)=0 and the padded W2 rows are zero,
    # so the padded columns contribute nothing: bit-for-bit the same result.
    h_mid = w1.shape[0]
    pad = _round_up(h_mid, 128) - h_mid
    w1f = jnp.pad(w1[:, :F].T, ((0, 0), (0, pad)))     # [F, Hmid_pad]
    w1h = jnp.pad(w1[:, F:].T, ((0, 0), (0, pad)))     # [H, Hmid_pad]
    b1r = jnp.pad(b1, (0, pad))[None, :]               # [1, Hmid_pad]
    w2t = jnp.pad(w2.T, ((0, pad), (0, 0)))            # [Hmid_pad, H]
    b2r = b2[None, :]                                   # [1, H]

    bm = _pick_batch_tile(B)
    grid = (pl.cdiv(B, bm),)

    # Weights / biases: same block every grid step -> DMA'd once, VMEM-resident.
    resident = lambda shape: pl.BlockSpec(shape, lambda i: (0, 0))

    return pl.pallas_call(
        _odenet_hi_kernel,
        out_shape=jax.ShapeDtypeStruct((B, H), hidden.dtype),
        grid=grid,
        in_specs=[
            pl.BlockSpec((bm, F), lambda i: (i, 0)),          # input  (batch-tiled)
            pl.BlockSpec((bm, H), lambda i: (i, 0)),          # hidden (batch-tiled)
            resident(w1f.shape), resident(w1h.shape), resident(b1r.shape),
            resident(w2t.shape), resident(b2r.shape),
        ],
        out_specs=pl.BlockSpec((bm, H), lambda i: (i, 0)),
        compiler_params=pltpu.CompilerParams(
            dimension_semantics=("parallel",)),               # megacore sharding on v7x
    )(inp, hidden, w1f, w1h, b1r, w2t, b2r)


def init_params(key, hidden_dim, feature_dim):
    """Matches nn.init.normal_(std=0.1) weights, zero biases; torch layout [out, in]."""
    d_in = hidden_dim + feature_dim
    h_mid = max(2 * d_in, 60)
    k1, k2 = jax.random.split(key, 2)
    return {
        "w1": 0.1 * jax.random.normal(k1, (h_mid, d_in), jnp.float32),
        "b1": jnp.zeros((h_mid,), jnp.float32),
        "w2": 0.1 * jax.random.normal(k2, (hidden_dim, h_mid), jnp.float32),
        "b2": jnp.zeros((hidden_dim,), jnp.float32),
    }


def reference_forward(inp, hidden, params):
    """Pure-JAX reference identical to the PyTorch forward (for verification)."""
    x = jnp.concatenate([inp, hidden], axis=1)
    z = jnp.tanh(x @ params["w1"].T + params["b1"])
    return jnp.tanh(z @ params["w2"].T + params["b2"])


if __name__ == "__main__":
    hidden_dim, feature_dim = 32, 16

    key = jax.random.PRNGKey(0)
    kp, kh, kx = jax.random.split(key, 3)
    params = init_params(kp, hidden_dim, feature_dim)
    t = jnp.float32(0.0)
    dt = jnp.float32(0.1)

    # Primary small check (single block).
    batch = 8
    hidden = jax.random.normal(kh, (batch, hidden_dim), jnp.float32)
    inp = jax.random.normal(kx, (batch, feature_dim), jnp.float32)
    out = jax.block_until_ready(odenet_hi_forward(inp, t, dt, hidden, params))
    ref = reference_forward(inp, hidden, params)
    assert out.shape == (batch, hidden_dim), out.shape
    assert jnp.allclose(out, ref, atol=1e-5, rtol=1e-5), float(jnp.max(jnp.abs(out - ref)))

    # Secondary check: ragged batch exercises cdiv tail masking and a >=2-step grid.
    batch2 = 200
    hidden2 = jax.random.normal(kh, (batch2, hidden_dim), jnp.float32)
    inp2 = jax.random.normal(kx, (batch2, feature_dim), jnp.float32)
    out2 = jax.block_until_ready(odenet_hi_forward(inp2, t, dt, hidden2, params))
    ref2 = reference_forward(inp2, hidden2, params)
    assert out2.shape == (batch2, hidden_dim), out2.shape
    assert jnp.allclose(out2, ref2, atol=1e-5, rtol=1e-5), float(jnp.max(jnp.abs(out2 - ref2)))

    print("KERNEL_OK")
</pallas_src>

<mosaic_0001>
module attributes {stable_mosaic.version = 11 : i64} {
  func.func @_odenet_hi_kernel(%arg0: i32, %arg1: memref<8x16xf32, #tpu.memory_space<vmem>>, %arg2: memref<8x32xf32, #tpu.memory_space<vmem>>, %arg3: memref<16x128xf32, #tpu.memory_space<vmem>>, %arg4: memref<32x128xf32, #tpu.memory_space<vmem>>, %arg5: memref<1x128xf32, #tpu.memory_space<vmem>>, %arg6: memref<128x32xf32, #tpu.memory_space<vmem>>, %arg7: memref<1x32xf32, #tpu.memory_space<vmem>>, %arg8: memref<8x32xf32, #tpu.memory_space<vmem>>) attributes {dimension_semantics = [#tpu.dimension_semantics<parallel>], iteration_bounds = array<i64: 1>, scalar_prefetch = 0 : i64, scratch_operands = 0 : i64, tpu.core_type = #tpu.core_type<tc>, window_params = [{transform_indices = @transform_0, window_bounds = array<i64: 8, 16>}, {transform_indices = @transform_1, window_bounds = array<i64: 8, 32>}, {pipeline_mode = #tpu.pipeline_mode<synchronous>, transform_indices = @transform_2, window_bounds = array<i64: 16, 128>}, {pipeline_mode = #tpu.pipeline_mode<synchronous>, transform_indices = @transform_3, window_bounds = array<i64: 32, 128>}, {pipeline_mode = #tpu.pipeline_mode<synchronous>, transform_indices = @transform_4, window_bounds = array<i64: 1, 128>}, {pipeline_mode = #tpu.pipeline_mode<synchronous>, transform_indices = @transform_5, window_bounds = array<i64: 128, 32>}, {pipeline_mode = #tpu.pipeline_mode<synchronous>, transform_indices = @transform_6, window_bounds = array<i64: 1, 32>}, {transform_indices = @transform_7, window_bounds = array<i64: 8, 32>}]} {
    %c0 = arith.constant 0 : index
    %c0_0 = arith.constant 0 : index
    %0 = vector.load %arg1[%c0, %c0_0] : memref<8x16xf32, #tpu.memory_space<vmem>>, vector<8x16xf32>
    %c0_1 = arith.constant 0 : index
    %c0_2 = arith.constant 0 : index
    %1 = vector.load %arg2[%c0_1, %c0_2] : memref<8x32xf32, #tpu.memory_space<vmem>>, vector<8x32xf32>
    %c0_3 = arith.constant 0 : index
    %c0_4 = arith.constant 0 : index
    %2 = vector.load %arg3[%c0_3, %c0_4] : memref<16x128xf32, #tpu.memory_space<vmem>>, vector<16x128xf32>
    %cst = arith.constant dense<0.000000e+00> : vector<8x128xf32>
    %3 = tpu.matmul %0, %2, %cst {dimension_numbers = #tpu.dot_dimension_numbers<[1], [0], [0], [1], [0, 0, 1, 1], [], []>} : vector<8x16xf32>, vector<16x128xf32>, vector<8x128xf32> -> vector<8x128xf32>
    %c0_5 = arith.constant 0 : index
    %c0_6 = arith.constant 0 : index
    %4 = vector.load %arg4[%c0_5, %c0_6] : memref<32x128xf32, #tpu.memory_space<vmem>>, vector<32x128xf32>
    %cst_7 = arith.constant dense<0.000000e+00> : vector<8x128xf32>
    %5 = tpu.matmul %1, %4, %cst_7 {dimension_numbers = #tpu.dot_dimension_numbers<[1], [0], [0], [1], [0, 0, 1, 1], [], []>} : vector<8x32xf32>, vector<32x128xf32>, vector<8x128xf32> -> vector<8x128xf32>
    %6 = arith.addf %3, %5 : vector<8x128xf32>
    %c0_8 = arith.constant 0 : index
    %c0_9 = arith.constant 0 : index
    %7 = vector.load %arg5[%c0_8, %c0_9] : memref<1x128xf32, #tpu.memory_space<vmem>>, vector<1x128xf32>
    %8 = vector.broadcast %7 : vector<1x128xf32> to vector<8x128xf32>
    %9 = arith.addf %6, %8 : vector<8x128xf32>
    %10 = math.tanh %9 : vector<8x128xf32>
    %c0_10 = arith.constant 0 : index
    %c0_11 = arith.constant 0 : index
    %11 = vector.load %arg6[%c0_10, %c0_11] : memref<128x32xf32, #tpu.memory_space<vmem>>, vector<128x32xf32>
    %cst_12 = arith.constant dense<0.000000e+00> : vector<8x32xf32>
    %12 = tpu.matmul %10, %11, %cst_12 {dimension_numbers = #tpu.dot_dimension_numbers<[1], [0], [0], [1], [0, 0, 1, 1], [], []>} : vector<8x128xf32>, vector<128x32xf32>, vector<8x32xf32> -> vector<8x32xf32>
    %c0_13 = arith.constant 0 : index
    %c0_14 = arith.constant 0 : index
    %13 = vector.load %arg7[%c0_13, %c0_14] : memref<1x32xf32, #tpu.memory_space<vmem>>, vector<1x32xf32>
    %14 = vector.broadcast %13 : vector<1x32xf32> to vector<8x32xf32>
    %15 = arith.addf %12, %14 : vector<8x32xf32>
    %16 = math.tanh %15 : vector<8x32xf32>
    %c0_15 = arith.constant 0 : index
    %c0_16 = arith.constant 0 : index
    %17 = vector.load %arg8[%c0_15, %c0_16] : memref<8x32xf32, #tpu.memory_space<vmem>>, vector<8x32xf32>
    tpu.vector_store %arg8[%c0_15, %c0_16], %16 {strides = array<i32>} : memref<8x32xf32, #tpu.memory_space<vmem>>, vector<8x32xf32>,
    return
  }
  func.func @transform_0(%arg0: i32) -> (i32, i32) {
    %c0_i32 = arith.constant 0 : i32
    %c0_i32_0 = arith.constant 0 : i32
    return %arg0, %c0_i32 : i32, i32
  }
  func.func @transform_1(%arg0: i32) -> (i32, i32) {
    %c0_i32 = arith.constant 0 : i32
    %c0_i32_0 = arith.constant 0 : i32
    return %arg0, %c0_i32 : i32, i32
  }
  func.func @transform_2(%arg0: i32) -> (i32, i32) {
    %c0_i32 = arith.constant 0 : i32
    %c0_i32_0 = arith.constant 0 : i32
    %c0_i32_1 = arith.constant 0 : i32
    return %c0_i32, %c0_i32_0 : i32, i32
  }
  func.func @transform_3(%arg0: i32) -> (i32, i32) {
    %c0_i32 = arith.constant 0 : i32
    %c0_i32_0 = arith.constant 0 : i32
    %c0_i32_1 = arith.constant 0 : i32
    return %c0_i32, %c0_i32_0 : i32, i32
  }
  func.func @transform_4(%arg0: i32) -> (i32, i32) {
    %c0_i32 = arith.constant 0 : i32
    %c0_i32_0 = arith.constant 0 : i32
    %c0_i32_1 = arith.constant 0 : i32
    return %c0_i32, %c0_i32_0 : i32, i32
  }
  func.func @transform_5(%arg0: i32) -> (i32, i32) {
    %c0_i32 = arith.constant 0 : i32
    %c0_i32_0 = arith.constant 0 : i32
    %c0_i32_1 = arith.constant 0 : i32
    return %c0_i32, %c0_i32_0 : i32, i32
  }
  func.func @transform_6(%arg0: i32) -> (i32, i32) {
    %c0_i32 = arith.constant 0 : i32
    %c0_i32_0 = arith.constant 0 : i32
    %c0_i32_1 = arith.constant 0 : i32
    return %c0_i32, %c0_i32_0 : i32, i32
  }
  func.func @transform_7(%arg0: i32) -> (i32, i32) {
    %c0_i32 = arith.constant 0 : i32
    %c0_i32_0 = arith.constant 0 : i32
    return %arg0, %c0_i32 : i32, i32
  }
}

</mosaic_0001>

<bundles_post_ra>
// kernel: odenet_hi_forward.1
= control target key start
LH: loop header
LB: loop body
LE: loop exit
PB: predicated region body
PF: predicated region fallthrough
CT: control target
= control target key end

     0   :  { %vm59_vm0 = vcmask 130048   ;;  %vm35_vm1 = vcmask 261120   ;;  %s306_s0 = inlined_call_operand.vmem [shape: f32[8,16], index: 0, kind: input, shape index: {}]   ;;  %s307_s1 = inlined_call_operand.vmem [shape: f32[8,32], index: 1, kind: input, shape index: {}]   ;;  %s308_s2 = inlined_call_operand.vmem [shape: f32[16,128], index: 2, kind: input, shape index: {}]   ;;  %s309_s3 = inlined_call_operand.vmem [shape: f32[32,128], index: 3, kind: input, shape index: {}]   ;;  %s310_s4 = inlined_call_operand.vmem [shape: f32[1,128], index: 4, kind: input, shape index: {}]   ;;  %s311_s5 = inlined_call_operand.vmem [shape: f32[128,32], index: 5, kind: input, shape index: {}]   ;;  %s312_s6 = inlined_call_operand.vmem [shape: f32[1,32], index: 6, kind: input, shape index: {}]   ;;  %s313_s7 = inlined_call_operand.hbm [shape: f32[8,32], index: 7, kind: output, shape index: {}]  }
   0x1   :  { %v34_v0 = vld [vmem:[%s309_s3 + $0x18] sm:$0xff]  ;;  %v33_v1 = vld [vmem:[%s309_s3 + $0x10] sm:$0xff]  ;;  %v30_v2 = vld [vmem:[%s308_s2 + $0x8] sm:$0xff] }
   0x2   :  { %51 = vmatpush.msra.mxu0 %v34_v0  ;;  %v29_v3 = vld [vmem:[%s308_s2] sm:$0xff]  ;;  %v32_v4 = vld [vmem:[%s309_s3 + $0x8] sm:$0xff]  ;;  %77 = vmatpush.msra.mxu1 %v30_v2  ;;  %v104_v6 = vld [vmem:[%s311_s5 + $0x78] sm:$0xff] }
   0x3   :  { %v27_v5 = vld [vmem:[%s306_s0] sm:$0xff]  ;;  %109 = vmatpush.msra.mxu2 %v104_v6  ;;  %v103_v7 = vld [vmem:[%s311_s5 + $0x70] sm:$0xff]  ;;  %v102_v10 = vld [vmem:[%s311_s5 + $0x68] sm:$0xff] }
   0x4   :  { %52 = vmatpush.msra.mxu0 %v33_v1  ;;  %v31_v8 = vld [vmem:[%s309_s3] sm:$0xff]  ;;  %78 = vmatpush.msra.mxu1 %v29_v3 }
   0x5   :  { %v28_v9 = vld [vmem:[%s307_s1] sm:$0xff]  ;;  %148 = vmatmul.msk.f32.vlgmr.msra.gmra.mxu1 %vm59_vm0, %v27_v5  ;;  %110 = vmatpush.msra.mxu2 %v103_v7 }
   0x6   :  { %53 = vmatpush.msra.mxu0 %v32_v4 }
   0x7   :  { %12 = vsyncpa [#allocation3], 0  ;;  %v101_v11 = vld [vmem:[%s311_s5 + $0x60] sm:$0xff]  ;;  %111 = vmatpush.msra.mxu2 %v102_v10  ;;  %v100_v12 = vld [vmem:[%s311_s5 + $0x58] sm:$0xff]  ;;  %s138_s25 = sshll.u32 %s313_s7, 4  ;;  %s139_s25 = int_to_ptr.hbm [resolvable:$true] %s138_s25 }
   0x8   :  { %54 = vmatpush.msra.mxu0 %v31_v8  ;;  %v99_v13 = vld [vmem:[%s311_s5 + $0x50] sm:$0xff]  ;;  %v98_v14 = vld [vmem:[%s311_s5 + $0x48] sm:$0xff]  ;;  %v97_v15 = vld [vmem:[%s311_s5 + $0x40] sm:$0xff] }
   0x9   :  { %147 = vmatmul.msk.f32.vlgmr.msra.gmra.mxu0 %vm35_vm1, %v28_v9  ;;  %112 = vmatpush.msra.mxu2 %v101_v11  ;;  %v96_v16 = vld [vmem:[%s311_s5 + $0x38] sm:$0xff]  ;;  %v95_v17 = vld [vmem:[%s311_s5 + $0x30] sm:$0xff]  ;;  %v94_v18 = vld [vmem:[%s311_s5 + $0x28] sm:$0xff] }
   0xa   :  { %v93_v19 = vld [vmem:[%s311_s5 + $0x20] sm:$0xff]  ;;  %v92_v20 = vld [vmem:[%s311_s5 + $0x18] sm:$0xff]  ;;  %v91_v21 = vld [vmem:[%s311_s5 + $0x10] sm:$0xff] }
   0xb   :  { %113 = vmatpush.msra.mxu2 %v100_v12  ;;  %v90_v22 = vld [vmem:[%s311_s5 + $0x8] sm:$0xff]  ;;  %v89_v23 = vld [vmem:[%s311_s5] sm:$0xff]  ;;  %s182_s5 = smov [#allocation2]  }
   0xc   :  { %v150_v25 = vld [vmem:[%s310_s4] ss:$0 sm:$0xff]  ;;  %s136_s23 = sshll.u32 %s182_s5, 4  ;;  %s137_s23 = int_to_ptr.vmem [resolvable:$true] %s136_s23 }
   0xd   :  { %114 = vmatpush.msra.mxu2 %v99_v13  ;;  %v151_v30 = vld [vmem:[%s312_s6] ss:$0 sm:$0xff] }
   0xf   :  { %115 = vmatpush.msra.mxu2 %v98_v14 }
  0x11   :  { %116 = vmatpush.msra.mxu2 %v97_v15 }
  0x13   :  { %117 = vmatpush.msra.mxu2 %v96_v16 }
  0x15   :  { %118 = vmatpush.msra.mxu2 %v95_v17 }
  0x17   :  { %119 = vmatpush.msra.mxu2 %v94_v18 }
  0x19   :  { %120 = vmatpush.msra.mxu2 %v93_v19 }
  0x1b   :  { %121 = vmatpush.msra.mxu2 %v92_v20 }
  0x1d   :  { %122 = vmatpush.msra.mxu2 %v91_v21 }
  0x1f   :  { %123 = vmatpush.msra.mxu2 %v90_v22 }
  0x21   :  { %124 = vmatpush.msra.mxu2 %v89_v23 }
  0x82   :  { %v80_v24 = vpop.f32.mrf.mxu1 }
  0x86   :  { %v56_v26 = vpop.f32.mrf.mxu0 }
  0x87   :  { %v81_v27 = vadd.f32 %v80_v24, %v56_v26 }
  0x89   :  { %v87_v28 = vadd.f32 %v150_v25, %v81_v27 }
  0x8b   :  { %152 = vtanh.f32 %v87_v28 }
  0x91   :  { %v153_v29 = vpop.eup %152 }
  0x92   :  { %125 = vmatmul.f32.vlgmr.msra.gmra.mxu2 %v153_v29 }
 0x115   :  { %v126_v31 = vpop.f32.mrf.mxu2 }
 0x116   :  { %v127_v32 = vadd.f32 %v151_v30, %v126_v31 }
 0x118   :  { %154 = vtanh.f32 %v127_v32 }
 0x11e   :  { %v155_v33 = vpop.eup %154 }
 0x11f   :  { %130 = vst.msk [vmem:[#allocation2] sm:$0xff] %vm35_vm1, %v155_v33 }
 0x120   :  { %141 = dma.vmem_to_hbm [thread:$0]  %s137_s23, 128, %s139_s25, [#allocation3]  }
 0x121   :  { %180 = dma.done.wait [#allocation3], 128  }
 0x122   :  { %181 = vsyncadd [#allocation3], 4294967168 }
 0x123   :  { %146 = vsyncpa [#allocation3], 1 }

</bundles_post_ra>
